<compile_context>
chip_gen: v7x
topology: tpu7x:2x2x1
jax: 0.10.0
libtpu: 0.0.40
codegen_flags: <defaults>
</compile_context>

<pallas_src>
import math

import jax
import jax.numpy as jnp
from jax.experimental import pallas as pl
from jax.experimental.pallas import tpu as pltpu


def build_position_encoding(d_model, h, w, temp_bug_fix=True, dtype=jnp.float32):
    """pe identical to PositionEncodingSine.pe[0, :, :h, :w], flattened to (d_model, h*w).

    The buffer values depend only on (channel, row, col), so building at (h, w)
    directly equals slicing the max_shape=(256, 256) register_buffer.
    """
    assert d_model % 4 == 0, "d_model must be a multiple of 4"
    # y_position = ones.cumsum(0) -> 1..h down rows; x_position = ones.cumsum(1) -> 1..w
    y_pos = jnp.broadcast_to(jnp.arange(1, h + 1, dtype=jnp.float32)[:, None], (h, w))
    x_pos = jnp.broadcast_to(jnp.arange(1, w + 1, dtype=jnp.float32)[None, :], (h, w))
    k = jnp.arange(0, d_model // 2, 2, dtype=jnp.float32)            # (d_model//4,)
    if temp_bug_fix:
        div_term = jnp.exp(k * (-math.log(10000.0) / (d_model // 2)))
    else:
        # Original (buggy) LoFTR formula kept for parity: `/ d_model // 2`
        # floor-divides the scalar before the multiply.
        div_term = jnp.exp(k * (-math.log(10000.0) / d_model // 2))
    div = div_term[:, None, None]                                     # (d_model//4, 1, 1)
    arg_x = x_pos[None] * div                                         # (d_model//4, h, w)
    arg_y = y_pos[None] * div
    # channel c = 4*g + r :  r=0 sin(x), r=1 cos(x), r=2 sin(y), r=3 cos(y)
    pe = jnp.stack([jnp.sin(arg_x), jnp.cos(arg_x),
                    jnp.sin(arg_y), jnp.cos(arg_y)], axis=1)          # (d_model//4, 4, h, w)
    pe = pe.reshape(d_model, h * w)                                   # lane-dense (C, H*W)
    return pe.astype(dtype)


def _add_pe_kernel(x_ref, pe_ref, o_ref):
    # x_ref / o_ref : (1, Ct, T) tile of one batch element; pe_ref : (Ct, T)
    # Native-dtype add when x and pe share a dtype; mixed dtypes promote.
    o_ref[0] = (x_ref[0] + pe_ref[...]).astype(o_ref.dtype)


def _largest_tile(n, base, cap):
    """Largest multiple of `base` that exactly divides n and is <= cap (0 if none)."""
    for m in range(min(cap, n) // base, 0, -1):
        cand = m * base
        if n % cand == 0:
            return cand
    return 0


def position_encoding_sine(x, pe_flat):
    """Forward: x (N, C, H, W) + pe broadcast over batch. Returns (N, C, H, W)."""
    n, c, h, w = x.shape
    hw = h * w
    assert pe_flat.shape == (c, hw), "pe buffer does not match input shape"
    itemsize = jnp.dtype(x.dtype).itemsize
    target_bytes = 4 << 20                      # ~4 MiB of x per block

    if hw % 128 == 0:
        # Tile along the flattened spatial (lane) axis; full C per block.
        cap_elems = max(128, (target_bytes // max(1, c * itemsize)) // 128 * 128)
        t = _largest_tile(hw, 128, cap_elems) or min(cap_elems, hw)
        # v7x: never degenerate to a single block when N == 1 (keep both TCs busy).
        if n == 1 and t == hw and hw > 128:
            t2 = _largest_tile(hw, 128, hw // 2)
            if t2:
                t = t2
        grid = (pl.cdiv(hw, t), n)
        x_spec = pl.BlockSpec((1, c, t), lambda j, b: (b, 0, j))
        pe_spec = pl.BlockSpec((c, t), lambda j, b: (0, j))        # constant over b
        o_spec = pl.BlockSpec((1, c, t), lambda j, b: (b, 0, j))
        block_bytes = c * t * itemsize
    else:
        # H*W not lane-aligned: keep the full H*W as the (full-dim) lane axis and
        # tile along channels (sublane axis, multiple of the dtype sublane tiling).
        sub = {4: 8, 2: 16, 1: 32}.get(itemsize, 8)
        cap_rows = max(sub, (target_bytes // max(1, hw * itemsize)) // sub * sub)
        ct = _largest_tile(c, sub, cap_rows) or c
        if n == 1 and ct == c and c > sub:
            ct2 = _largest_tile(c, sub, c // 2)
            if ct2:
                ct = ct2
        grid = (pl.cdiv(c, ct), n)
        x_spec = pl.BlockSpec((1, ct, hw), lambda j, b: (b, j, 0))
        pe_spec = pl.BlockSpec((ct, hw), lambda j, b: (j, 0))      # constant over b
        o_spec = pl.BlockSpec((1, ct, hw), lambda j, b: (b, j, 0))
        block_bytes = ct * hw * itemsize

    # x-in + out double-buffered (4 blocks) + pe double-buffered (~2 blocks) + margin.
    vmem_bytes = int(min(6 * block_bytes + (4 << 20), 48 << 20))

    out = pl.pallas_call(
        _add_pe_kernel,
        out_shape=jax.ShapeDtypeStruct((n, c, hw), x.dtype),
        grid_spec=pltpu.PrefetchScalarGridSpec(
            num_scalar_prefetch=0,
            grid=grid,
            in_specs=[x_spec, pe_spec],
            out_specs=o_spec,
        ),
        input_output_aliases={0: 0},            # x (operand 0) aliased to output 0
        compiler_params=pltpu.CompilerParams(
            dimension_semantics=("parallel", "parallel"),
            vmem_limit_bytes=vmem_bytes),
    )(x.reshape(n, c, hw), pe_flat)
    return out.reshape(n, c, h, w)


if __name__ == "__main__":
    key = jax.random.PRNGKey(0)

    # --- test 1: lane-aligned spatial extent (H*W multiple of 128) ---
    N, C, H, W = 2, 32, 16, 16                  # d_model=32, H*W=256
    x = jax.random.normal(key, (N, C, H, W), jnp.float32)
    assert H <= 256 and W <= 256
    pe_flat = build_position_encoding(C, H, W, temp_bug_fix=True, dtype=x.dtype)
    ref = x + pe_flat.reshape(1, C, H, W)       # computed before the (aliased) call
    y = position_encoding_sine(x, pe_flat)
    jax.block_until_ready(y)
    assert y.shape == (N, C, H, W)
    assert float(jnp.max(jnp.abs(y - ref))) < 1e-5, "mismatch vs reference (aligned)"

    # --- test 2: non-128-aligned H*W (channel-tiled path), N=1 ---
    N2, C2, H2, W2 = 1, 32, 6, 10               # H*W = 60
    x2 = jax.random.normal(jax.random.PRNGKey(1), (N2, C2, H2, W2), jnp.float32)
    pe2 = build_position_encoding(C2, H2, W2, temp_bug_fix=True, dtype=x2.dtype)
    ref2 = x2 + pe2.reshape(1, C2, H2, W2)
    y2 = position_encoding_sine(x2, pe2)
    jax.block_until_ready(y2)
    assert y2.shape == (N2, C2, H2, W2)
    assert float(jnp.max(jnp.abs(y2 - ref2))) < 1e-5, "mismatch vs reference (unaligned)"

    print("KERNEL_OK")
</pallas_src>

<mosaic_0001>
module attributes {stable_mosaic.version = 11 : i64} {
  func.func @_add_pe_kernel(%arg0: i32, %arg1: i32, %arg2: memref<1x32x256xf32, #tpu.memory_space<vmem>>, %arg3: memref<32x256xf32, #tpu.memory_space<vmem>>, %arg4: memref<1x32x256xf32, #tpu.memory_space<vmem>>) attributes {dimension_semantics = [#tpu.dimension_semantics<parallel>, #tpu.dimension_semantics<parallel>], iteration_bounds = array<i64: 1, 2>, scalar_prefetch = 0 : i64, scratch_operands = 0 : i64, tpu.core_type = #tpu.core_type<tc>, window_params = [{transform_indices = @transform_0, window_bounds = array<i64: 1, 32, 256>}, {transform_indices = @transform_1, window_bounds = array<i64: 32, 256>}, {transform_indices = @transform_2, window_bounds = array<i64: 1, 32, 256>}]} {
    %c0 = arith.constant 0 : index
    %c0_0 = arith.constant 0 : index
    %c0_1 = arith.constant 0 : index
    %0 = vector.load %arg2[%c0, %c0_0, %c0_1] : memref<1x32x256xf32, #tpu.memory_space<vmem>>, vector<1x32x256xf32>
    %1 = vector.shape_cast %0 : vector<1x32x256xf32> to vector<32x256xf32>
    %c0_2 = arith.constant 0 : index
    %c0_3 = arith.constant 0 : index
    %2 = vector.load %arg3[%c0_2, %c0_3] : memref<32x256xf32, #tpu.memory_space<vmem>>, vector<32x256xf32>
    %3 = arith.addf %1, %2 : vector<32x256xf32>
    %c0_4 = arith.constant 0 : index
    %c0_5 = arith.constant 0 : index
    %c0_6 = arith.constant 0 : index
    %4 = vector.load %arg4[%c0_4, %c0_5, %c0_6] : memref<1x32x256xf32, #tpu.memory_space<vmem>>, vector<1x32x256xf32>
    %5 = vector.shape_cast %4 : vector<1x32x256xf32> to vector<32x256xf32>
    %6 = vector.shape_cast %3 : vector<32x256xf32> to vector<1x32x256xf32>
    tpu.vector_store %arg4[%c0_4, %c0_5, %c0_6], %6 {strides = array<i32>} : memref<1x32x256xf32, #tpu.memory_space<vmem>>, vector<1x32x256xf32>,
    return
  }
  func.func @transform_0(%arg0: i32, %arg1: i32) -> (i32, i32, i32) {
    %c0_i32 = arith.constant 0 : i32
    %c0_i32_0 = arith.constant 0 : i32
    return %arg1, %c0_i32, %arg0 : i32, i32, i32
  }
  func.func @transform_1(%arg0: i32, %arg1: i32) -> (i32, i32) {
    %c0_i32 = arith.constant 0 : i32
    %c0_i32_0 = arith.constant 0 : i32
    return %c0_i32, %arg0 : i32, i32
  }
  func.func @transform_2(%arg0: i32, %arg1: i32) -> (i32, i32, i32) {
    %c0_i32 = arith.constant 0 : i32
    %c0_i32_0 = arith.constant 0 : i32
    return %arg1, %c0_i32, %arg0 : i32, i32, i32
  }
}

</mosaic_0001>

<bundles_post_ra>
// kernel: tpu_custom_call.1
= control target key start
LH: loop header
LB: loop body
LE: loop exit
PB: predicated region body
PF: predicated region fallthrough
CT: control target
= control target key end

     0   :  { %7 = vsyncpa [#allocation3], 0  ;;  %s772_s0 = inlined_call_operand.hbm [shape: f32[2,32,256], index: 0, kind: input, shape index: {}, may-alias: {0,2}]   ;;  %s773_s1 = inlined_call_operand.vmem [shape: f32[32,256], index: 1, kind: input, shape index: {}]   ;;  %s774_s2 = inlined_call_operand.hbm [shape: f32[2,32,256], index: 2, kind: output, shape index: {}, may-alias: {0,2}]  }
   0x1   :  { %9 = vsyncpa [#allocation3 + $0x1], 0 }
   0x2   :  { %10 = vsyncpa [#allocation4], 0 }
   0x3   :  { %12 = vsyncpa [#allocation4 + $0x1], 0  ;;  %s573_s9 = smov 0   ;;  %s575_s10 = smov 0  }
   0x4   :  { %s577_s11 = smov 0   ;;  %s579_s12 = smov 0  }
   0x5   :  { %s581_s13 = smov 0   ;;  %s583_s14 = smov 0  }
   0x6 LB: > { %s354_s15 = sadd.s32 4294967295, %s550_s14   ;;  %s355_s16 = sadd.s32 4294967294, %s550_s14   ;;  %s550_s14 = sphi %s583_s14, %s18_s14   ;;  %s546_s13 = sphi %s581_s13, %s789_s13   ;;  %s542_s12 = sphi %s579_s12, %s788_s12   ;;  %s538_s11 = sphi %s577_s11, %s787_s11   ;;  %s534_s10 = sphi %s575_s10, %s786_s10   ;;  %s530_s9 = sphi %s573_s9, %s785_s9  }
   0x7   : > { %s27_s17 = sadd.s32 1, %s546_s13  ;;  %s39_s18 = sadd.s32 1, %s538_s11 }
   0x8   : > { %p28_p0 = scmp.ge.s32.totalorder %s27_s17, 2  ;;  %p46_p1 = scmp.ne.s32.totalorder %s538_s11, %s534_s10 }
   0x9   : > { %p47_p2 = scmp.eq.s32.totalorder %s550_s14, 0  ;;  %p52_p3 = scmp.ne.s32.totalorder %s534_s10, %s530_s9 }
   0xa   : > { %s791_s17 = smov (%p28_p0, %s27_s17), 0  ;;  %p53_p5 = scmp.eq.s32.totalorder %s354_s15, 0 }
   0xb   : > { %p614_p4 = por %p47_p2, %p46_p1  ;;  %s34_s20 = ssub.s32 %s546_s13, %s791_s17 }
   0xc   : > { %p104_p6 = scmp.eq.s32.totalorder %s354_s15, 1  ;;  %p37_p7 = scmp.eq.s32.totalorder %s34_s20, 0 }
   0xd   : > { %p620_p8 = por %p53_p5, %p52_p3  ;;  %p110_p10 = scmp.eq.s32.totalorder %s355_s16, 1 }
   0xe   : > { %p624_p9 = por %p104_p6, %p46_p1  ;;  %p384_p13 = scmp.lt.s32.totalorder %s550_s14, 2 }
   0xf   : > { %s629_s23 = scalar_select %p37_p7, %s538_s11, %s39_s18  }
  0x10   : > { %s778_s22 = scalar_select %p624_p9, 1, 0 }
  0x11   : > { %p631_p11 = por %p110_p10, %p52_p3  ;;  %s139_s25 = sand.u32 1, %s538_s11  }
  0x12   : > { %s359_s26 = sshll.u32 %s139_s25, 6  ;;  %s370_s27 = sshll.u32 %s546_s13, 10 }
  0x13   : > { %s779_s24 = scalar_select %p631_p11, 1, 0 }
  0x14   : > { %s642_s30 = scalar_lea.hbm %s772_s0, %s370_s27  ;;  %s143_s3 = scalar_lea.vmem [#allocation2], %s359_s26 }
  0x15   : > { %s152_s4 = sshll.u32 %s143_s3, 4  ;;  %p648_p0 = pnand %p384_p13, %p614_p4  ;;  %s644_s4 = int_to_ptr.vmem [resolvable:$true] %s152_s4 }
  0x16   : > { %s653_s6 = scalar_lea.sflag [#allocation3], %s139_s25  ;;  %s438_s7 = scalar_lea.hbm %s642_s30, 1024 }
  0x17   : > { %p439_p2 = scmp.ne.s32.totalorder %s642_s30, %s438_s7  ;;  %p440_p3 = pneg %p648_p0 }
  0x18   : > { %s443_s16 = scalar_lea.hbm %s772_s0, 2048  ;;  %p444_p4 = scmp.lt.u32.totalorder %s642_s30, %s772_s0 }
  0x19   : > { %p441_p5 = pnand %p440_p3, %p439_p2  ;;  %p445_p7 = scmp.lt.u32.totalorder %s443_s16, %s438_s7 }
  0x1a   : > { %p447_p13 = scmp.lt.u32.totalorder %s438_s7, %s642_s30 }
  0x1b   : > { %p442_p6 = pneg %p441_p5  ;;  %p446_p10 = por %p445_p7, %p444_p4 }
  0x1d   : > { %p448_p12 = por %p447_p13, %p446_p10 }
  0x1f   : > { %p449_p1 = pnand %p448_p12, %p442_p6 }
  0x21   : > { %452 = shalt.err (!%p449_p1)
}
  0x22   : > { %s453_s20 = scalar_lea.vmem %s644_s4, 1024  ;;  %s552_s25 = smov [#allocation2]  }
  0x23   : > { %p454_p2 = scmp.ne.s32.totalorder %s644_s4, %s453_s20  ;;  %s458_s26 = sshll.u32 %s552_s25, 4  ;;  %s459_s26 = int_to_ptr.vmem [resolvable:$false] %s458_s26 }
  0x24   : > { %s460_s27 = scalar_lea.vmem %s459_s26, 2048  ;;  %p461_p9 = scmp.lt.s32.totalorder %s644_s4, %s459_s26 }
  0x25   : > { %p456_p5 = pnand %p454_p2, %p440_p3  ;;  %p462_p4 = scmp.lt.s32.totalorder %s460_s27, %s453_s20 }
  0x27   : > { %p457_p11 = pneg %p456_p5  ;;  %p463_p7 = por %p462_p4, %p461_p9 }
  0x29   : > { %p464_p10 = pnand %p463_p7, %p457_p11 }
  0x2b   : > { %467 = shalt.err (!%p464_p10)
}
  0x2c   : > { %s553_s28 = smov 256   ;;  %s554_s29 = smov 16  }
  0x2d   : > { %379 = dma.hbm_to_vmem [thread:$0]  (!%p648_p0), %s642_s30, 1024, %s644_s4, %s653_s6, %s553_s28, %s553_s28, %s554_s29  }
  0x2e   : > { %p160_p12 = scmp.lt.s32.totalorder %s550_s14, 3  ;;  %p781_p1 = scmp.ge.s32.totalorder %s550_s14, 1 }
  0x30   : > { %p161_p3 = pnand %p781_p1, %p160_p12 }
  0x31   : > { %s685_s3 = sand.u32 (!%p161_p3), 1, %s534_s10  }
  0x32   : > { %164 = sbr.rel (%p161_p3) target bundleno = 85 (0x55), region = 28  ;;  %s363_s7 = sshll.u32 (!%p161_p3), %s685_s3, 6 }
  0x33   : > { %s167_s8 = scalar_lea.sflag (!%p161_p3), [#allocation3], %s685_s3  ;;  %s170_s15 = scalar_lea.vmem (!%p161_p3), [#allocation2], %s363_s7 }
  0x39   : > { %521 = dma.done.wait (%p620_p8), %s167_s8, 1024  }
  0x3a   : > { %523 = vsyncadd (%p620_p8), %s167_s8, 4294966272  ;;  %v204_v0 = vld [vmem:[%s170_s15] sm:$0xff]  ;;  %v205_v2 = vld [vmem:[%s170_s15 + $0x8] sm:$0xff]  ;;  %s195_s19 = scalar_lea.vmem [#allocation5], %s363_s7  ;;  %s371_s26 = sshll.u32 %s542_s12, 10 }
  0x3b   : > { %v212_v1 = vld [vmem:[%s773_s1] sm:$0xff]  ;;  %v213_v4 = vld [vmem:[%s773_s1 + $0x8] sm:$0xff]  ;;  %v206_v5 = vld [vmem:[%s170_s15 + $0x10] sm:$0xff]  ;;  %s252_s21 = sshll.u32 %s195_s19, 4  ;;  %s723_s16 = scalar_lea.hbm %s774_s2, %s371_s26  ;;  %s715_s21 = int_to_ptr.vmem [resolvable:$true] %s252_s21 }
  0x3c   : > { %v220_v3 = vadd.f32 %v212_v1, %v204_v0  ;;  %v214_v6 = vld [vmem:[%s773_s1 + $0x10] sm:$0xff]  ;;  %v221_v7 = vadd.f32 %v213_v4, %v205_v2  ;;  %v207_v9 = vld [vmem:[%s170_s15 + $0x18] sm:$0xff]  ;;  %v208_v11 = vld [vmem:[%s170_s15 + $0x20] sm:$0xff]  ;;  %s468_s18 = scalar_lea.vmem %s715_s21, 1024  ;;  %p782_p9 = scmp.ne.s32.totalorder %s778_s22, 0 }
  0x3d   : > { %v222_v8 = vadd.f32 %v214_v6, %v206_v5  ;;  %v215_v10 = vld [vmem:[%s773_s1 + $0x18] sm:$0xff]  ;;  %v216_v13 = vld [vmem:[%s773_s1 + $0x20] sm:$0xff]  ;;  %v209_v14 = vld [vmem:[%s170_s15 + $0x28] sm:$0xff]  ;;  %p469_p8 = scmp.ne.s32.totalorder %s715_s21, %s468_s18  ;;  %s555_s20 = smov [#allocation5]  }
  0x3e   : > { %228 = vst [vmem:[%s195_s19] sm:$0xff] %v220_v3  ;;  %v223_v12 = vadd.f32 %v215_v10, %v207_v9  ;;  %v217_v15 = vld [vmem:[%s773_s1 + $0x28] sm:$0xff]  ;;  %229 = vst [vmem:[%s195_s19 + $0x8] sm:$0xff] %v221_v7  ;;  %v224_v16 = vadd.f32 %v216_v13, %v208_v11  ;;  %v210_v18 = vld [vmem:[%s170_s15 + $0x30] sm:$0xff]  ;;  %s472_s25 = sshll.u32 %s555_s20, 4  ;;  %s473_s25 = int_to_ptr.vmem [resolvable:$false] %s472_s25 }
  0x3f   : > { %230 = vst [vmem:[%s195_s19 + $0x10] sm:$0xff] %v222_v8  ;;  %v225_v17 = vadd.f32 %v217_v15, %v209_v14  ;;  %v218_v19 = vld [vmem:[%s773_s1 + $0x30] sm:$0xff]  ;;  %v211_v20 = vld [vmem:[%s170_s15 + $0x38] sm:$0xff]  ;;  %s237_s15 = scalar_lea.sflag [#allocation4], %s685_s3  ;;  %p470_p11 = pnand %p469_p8, %p782_p9 }
  0x40   : > { %231 = vst [vmem:[%s195_s19 + $0x18] sm:$0xff] %v223_v12  ;;  %v226_v21 = vadd.f32 %v218_v19, %v210_v18  ;;  %v219_v22 = vld [vmem:[%s773_s1 + $0x38] sm:$0xff]  ;;  %232 = vst [vmem:[%s195_s19 + $0x20] sm:$0xff] %v224_v16  ;;  %s474_s27 = scalar_lea.vmem %s473_s25, 2048  ;;  %p475_p6 = scmp.lt.s32.totalorder %s715_s21, %s473_s25 }
  0x41   : > { %233 = vst [vmem:[%s195_s19 + $0x28] sm:$0xff] %v225_v17  ;;  %v227_v23 = vadd.f32 %v219_v22, %v211_v20  ;;  %p471_p0 = pneg %p470_p11  ;;  %p476_p13 = scmp.lt.s32.totalorder %s474_s27, %s468_s18 }
  0x42   : > { %234 = vst [vmem:[%s195_s19 + $0x30] sm:$0xff] %v226_v21 }
  0x43   : > { %235 = vst [vmem:[%s195_s19 + $0x38] sm:$0xff] %v227_v23  ;;  %p477_p2 = por %p476_p13, %p475_p6 }
  0x45   : > { %p478_p5 = pnand %p477_p2, %p471_p0 }
  0x47   : > { %481 = shalt.err (!%p478_p5)
}
  0x48   : > { %s482_s19 = scalar_lea.hbm %s723_s16, 1024  ;;  %s486_s29 = scalar_lea.hbm %s774_s2, 2048 }
  0x49   : > { %p483_p4 = scmp.ne.s32.totalorder %s723_s16, %s482_s19  ;;  %p487_p12 = scmp.lt.u32.totalorder %s723_s16, %s774_s2 }
  0x4a   : > { %p488_p1 = scmp.lt.u32.totalorder %s486_s29, %s482_s19  ;;  %p490_p8 = scmp.lt.u32.totalorder %s482_s19, %s723_s16 }
  0x4b   : > { %p484_p7 = pnand %p483_p4, %p782_p9 }
  0x4c   : > { %p489_p3 = por %p488_p1, %p487_p12 }
  0x4d   : > { %p485_p10 = pneg %p484_p7 }
  0x4e   : > { %p491_p11 = por %p490_p8, %p489_p3 }
  0x50   : > { %p492_p0 = pnand %p491_p11, %p485_p10 }
  0x52   : > { %495 = shalt.err (!%p492_p0)
}
  0x53   : > { %s556_s30 = smov 256   ;;  %s557_s12 = smov 16  }
  0x54   : > { %374 = dma.vmem_to_hbm [thread:$0]  (%p782_p9), %s715_s21, 1024, %s723_s16, %s237_s15, %s556_s30, %s556_s30, %s557_s12  }
  0x55 PF: > { %s267_s4 = sand.u32 1, %s530_s9   ;;  %p783_p6 = scmp.ne.s32.totalorder %s779_s24, 0 }
  0x56   : > { %p784_p13 = scmp.ge.s32.totalorder %s550_s14, 2  ;;  %s268_s5 = scalar_lea.sflag [#allocation4], %s267_s4 }
  0x58   : > { %p381_p2 = pnand %p784_p13, %p783_p6 }
  0x5a   : > { %525 = dma.done.wait (!%p381_p2), %s268_s5, 1024  }
  0x5b   : > { %527 = vsyncadd (!%p381_p2), %s268_s5, 4294966272  ;;  %s18_s14 = sadd.s32 1, %s550_s14   ;;  %s785_s9 = smov %s534_s10 }
  0x5c   : > { %p15_p5 = scmp.ge.s32.totalorder %s18_s14, 4   ;;  %s786_s10 = smov %s538_s11 }
  0x5d   : > { %s787_s11 = smov %s629_s23  ;;  %s788_s12 = smov %s546_s13 }
  0x5e   : > { %s789_s13 = smov %s791_s17  ;;  %17 = sbr.rel (!%p15_p5) target bundleno = 6 (0x6), region = 76 }
  0x65   :  { %273 = vsyncpa [#allocation3], 1 }
  0x66   :  { %275 = vsyncpa [#allocation3 + $0x1], 1 }
  0x67   :  { %276 = vsyncpa [#allocation4], 1 }
  0x68   :  { %278 = vsyncpa [#allocation4 + $0x1], 1 }

</bundles_post_ra>
